<compile_context>
chip_gen: v6e
topology: v6e:2x2x1
jax: 0.10.0
libtpu: 0.0.40
codegen_flags: <defaults>
</compile_context>

<pallas_src>
import jax
import jax.numpy as jnp
from jax.experimental import pallas as pl
from jax.experimental.pallas import tpu as pltpu

EPS = 1e-5


def _make_block_kernel(N, H, W, C):
    """Kernel factory (closes over the static geometry)."""
    WC = W * C
    HN = H * N                       # rows are h-major: row r = h*N + n
    SH = N                           # row shift of one y-tap
    inv_count = 1.0 / float(N * H * W)   # BN sample count per channel

    def kernel(x_ref, fold_ref, w1_ref, g1_ref, b1_ref, w2_ref, g2_ref, b2_ref,
               o_ref, acc_ref, h1_ref):
        # x_ref   : (H*N, W*C) f32   lane-dense activation, h-major rows (shortcut too)
        # fold_ref: (W*C, W*C) f32   0/1 channel-match matrix (fold + re-tile BN stats)
        # w{1,2}  : (3*W*C, W*C) bf16 block-banded conv weights (x-taps + x-pad folded)
        # g/b     : (1, W*C) f32     BN gamma/beta pre-tiled to lane width
        # o_ref   : (H*N, W*C) f32
        # acc_ref : (H*N, W*C) f32   conv accumulator scratch
        # h1_ref  : (H*N, W*C) bf16  conv1 output (bf16 operand for conv2)

        def conv(src_bf16, w_ref):
            # One MXU dot per y-tap, accumulated into acc_ref (no concatenated
            # patch buffer). y zero-padding == skip the out-of-range tap rows.
            acc_ref[...] = jnp.dot(src_bf16, w_ref[WC:2 * WC, :],
                                   preferred_element_type=jnp.float32)
            # top tap (input row h-1) contributes to output rows h >= 1
            acc_ref[SH:, :] += jnp.dot(src_bf16[:HN - SH, :], w_ref[0:WC, :],
                                       preferred_element_type=jnp.float32)
            # bottom tap (input row h+1) contributes to output rows h <= H-2
            acc_ref[:HN - SH, :] += jnp.dot(src_bf16[SH:, :], w_ref[2 * WC:, :],
                                            preferred_element_type=jnp.float32)
            return acc_ref[...]

        def bn(acc, g_t, b_t):
            # Single pass: sum + sum-of-squares together; var = E[x^2] - mean^2.
            row_sum = jnp.sum(acc, axis=0, keepdims=True)            # (1, WC)
            row_ssq = jnp.sum(acc * acc, axis=0, keepdims=True)      # (1, WC)
            stats = jnp.concatenate([row_sum, row_ssq], axis=0)      # (2, WC)
            folded = jnp.dot(stats, fold_ref[...],
                             preferred_element_type=jnp.float32) * inv_count
            mean_t = folded[0:1, :]
            var_t = folded[1:2, :] - mean_t * mean_t
            scale_t = g_t * jax.lax.rsqrt(var_t + EPS)     # rsqrt -> EUP slot
            shift_t = b_t - mean_t * scale_t
            return acc * scale_t + shift_t                 # 1 mul + 1 add / element

        x_f32 = x_ref[...]

        # ---- conv1 -> bn1 -> relu (conv1 reads x directly, no pad copy) ----
        a1 = conv(x_f32.astype(jnp.bfloat16), w1_ref)
        h1 = jnp.maximum(bn(a1, g1_ref[...], b1_ref[...]), 0.0)
        h1_ref[...] = h1.astype(jnp.bfloat16)

        # ---- conv2 -> bn2 ----
        a2 = conv(h1_ref[...], w2_ref)
        h2 = bn(a2, g2_ref[...], b2_ref[...])

        # ---- identity shortcut + relu (lane-dense, unmasked stores) ----
        o_ref[...] = jnp.maximum(h2 + x_f32, 0.0)

    return kernel


def _banded_conv_weight(w_hwio, W):
    """(3, 3, Cin, Cout) HWIO -> (3*W*C, W*C) block-banded matrix.

    Column taps (kx) and the x-direction zero padding are folded into the MXU
    contraction dimension; row taps (ky) are stacked along the contraction dim
    so the kernel can slice one (WC, WC) band per y-tap.
    (Precomputed once per layer in a real model.)
    """
    KH, KW, Cin, Cout = w_hwio.shape
    assert KH == 3 and KW == 3 and Cin == Cout, "identity-shortcut block only"
    C = Cin
    big = jnp.zeros((3, W * C, W * C), jnp.float32)
    for kx in range(3):
        for xo in range(W):
            xi = xo + kx - 1
            if 0 <= xi < W:
                big = big.at[:, xi * C:(xi + 1) * C,
                             xo * C:(xo + 1) * C].set(w_hwio[:, kx])
    return big.reshape(3 * W * C, W * C)


def basic_block_res20(x_nchw, w1, g1, b1, w2, g2, b2):
    """NCHW in / NCHW out, identity-shortcut BasicBlock forward."""
    x = jnp.transpose(x_nchw, (0, 2, 3, 1)).astype(jnp.float32)     # -> NHWC
    N, H, W, C = x.shape
    WC, HN = W * C, H * N            # best when W*C is a multiple of 128
    # h-major lane-dense layout: (N,H,W,C) -> (H,N,W,C) -> (H*N, W*C)
    x2 = jnp.transpose(x, (1, 0, 2, 3)).reshape(HN, WC)

    # bf16 MXU operands; f32 accumulation happens in-kernel.
    w1b = _banded_conv_weight(w1, W).astype(jnp.bfloat16)
    w2b = _banded_conv_weight(w2, W).astype(jnp.bfloat16)

    # 0/1 channel-match matrix for BN stat fold + re-tile (kept f32 for exact stats).
    idx = jnp.arange(WC)
    fold = (idx[:, None] % C == idx[None, :] % C).astype(jnp.float32)

    def tile_param(p):               # (C,) -> (1, W*C), lane-dense
        return jnp.tile(p.reshape(1, C).astype(jnp.float32), (1, W))

    g1t, b1t, g2t, b2t = (tile_param(p) for p in (g1, b1, g2, b2))

    # ---- VMEM budget from the actual resident footprint (+ headroom) ----
    F32, BF16 = 4, 2
    resident = (HN * WC * F32                      # x
                + WC * WC * F32                    # fold
                + 2 * 3 * WC * WC * BF16           # banded weights
                + 4 * WC * F32                     # gamma/beta
                + HN * WC * F32                    # output
                + HN * WC * F32 + HN * WC * BF16)  # acc + h1 scratch
    vmem_limit = int(min(max(4 * resident, 8 << 20), 64 << 20))

    # ---- advisory cost estimate ----
    conv_flops = 2 * (2 * WC * WC * (HN + 2 * (HN - N)))       # 3 banded dots / conv
    bn_flops = 2 * (2 * 2 * WC * WC + 8 * HN * WC)             # stat fold + elementwise
    bytes_accessed = (HN * WC * F32 * 2                        # x in + out
                      + WC * WC * F32 + 2 * 3 * WC * WC * BF16 + 4 * WC * F32)

    out2 = pl.pallas_call(
        _make_block_kernel(N, H, W, C),
        out_shape=jax.ShapeDtypeStruct((HN, WC), jnp.float32),
        in_specs=[pl.BlockSpec(memory_space=pltpu.MemorySpace.VMEM)] * 8,
        out_specs=pl.BlockSpec(memory_space=pltpu.MemorySpace.VMEM),
        scratch_shapes=[pltpu.VMEM((HN, WC), jnp.float32),     # conv accumulator
                        pltpu.VMEM((HN, WC), jnp.bfloat16)],   # conv1 output (bf16)
        compiler_params=pltpu.CompilerParams(vmem_limit_bytes=vmem_limit),
        cost_estimate=pl.CostEstimate(flops=conv_flops + bn_flops,
                                      transcendentals=2 * WC,
                                      bytes_accessed=bytes_accessed),
    )(x2, fold, w1b, g1t, b1t, w2b, g2t, b2t)

    out = out2.reshape(H, N, W, C)
    return jnp.transpose(out, (1, 3, 0, 2))                    # -> NCHW


def _ref_forward_nhwc(x, w1, g1, b1, w2, g2, b2):
    """Pure-JAX f32 reference (NHWC) for correctness checking."""
    def conv(h, w):
        return jax.lax.conv_general_dilated(
            h, w, window_strides=(1, 1), padding="SAME",
            dimension_numbers=("NHWC", "HWIO", "NHWC"))

    def bn(h, g, b):
        m = jnp.mean(h, axis=(0, 1, 2))
        v = jnp.mean((h - m) ** 2, axis=(0, 1, 2))
        return (h - m) / jnp.sqrt(v + EPS) * g + b

    h = jax.nn.relu(bn(conv(x, w1), g1, b1))
    h = bn(conv(h, w2), g2, b2)
    return jax.nn.relu(h + x)


if __name__ == "__main__":
    key = jax.random.PRNGKey(0)
    ks = jax.random.split(key, 7)

    N, C, H, W = 2, 8, 16, 16            # in_planes == planes == 8, stride == 1
    x = jax.random.normal(ks[0], (N, C, H, W), jnp.float32)
    w1 = 0.1 * jax.random.normal(ks[1], (3, 3, C, C), jnp.float32)   # HWIO
    g1 = 1.0 + 0.1 * jax.random.normal(ks[2], (C,), jnp.float32)
    b1 = 0.1 * jax.random.normal(ks[3], (C,), jnp.float32)
    w2 = 0.1 * jax.random.normal(ks[4], (3, 3, C, C), jnp.float32)   # HWIO
    g2 = 1.0 + 0.1 * jax.random.normal(ks[5], (C,), jnp.float32)
    b2 = 0.1 * jax.random.normal(ks[6], (C,), jnp.float32)

    out = jax.block_until_ready(basic_block_res20(x, w1, g1, b1, w2, g2, b2))

    # Verify against the pure-f32 JAX reference. The kernel's MXU path is bf16
    # (f32 accumulation), so the tolerance is set for bf16 operand rounding.
    x_nhwc = jnp.transpose(x, (0, 2, 3, 1))
    ref = _ref_forward_nhwc(x_nhwc, w1, g1, b1, w2, g2, b2)
    ref_nchw = jnp.transpose(ref, (0, 3, 1, 2))
    assert out.shape == (N, C, H, W)
    err = float(jnp.max(jnp.abs(out - ref_nchw)))
    assert err < 5e-2, f"max abs err {err}"

    print("KERNEL_OK")
</pallas_src>

<mosaic_0001>
module attributes {stable_mosaic.version = 11 : i64} {
  func.func @kernel(%arg0: memref<32x128xf32, #tpu.memory_space<vmem>>, %arg1: memref<128x128xf32, #tpu.memory_space<vmem>>, %arg2: memref<384x128xbf16, #tpu.memory_space<vmem>>, %arg3: memref<1x128xf32, #tpu.memory_space<vmem>>, %arg4: memref<1x128xf32, #tpu.memory_space<vmem>>, %arg5: memref<384x128xbf16, #tpu.memory_space<vmem>>, %arg6: memref<1x128xf32, #tpu.memory_space<vmem>>, %arg7: memref<1x128xf32, #tpu.memory_space<vmem>>, %arg8: memref<32x128xf32, #tpu.memory_space<vmem>>, %arg9: memref<32x128xf32, #tpu.memory_space<vmem>>, %arg10: memref<32x128xbf16, #tpu.memory_space<vmem>>) attributes {dimension_semantics = [], scalar_prefetch = 0 : i64, scratch_operands = 2 : i64, tpu.core_type = #tpu.core_type<tc>} {
    %c0 = arith.constant 0 : index
    %c0_0 = arith.constant 0 : index
    %0 = vector.load %arg0[%c0, %c0_0] : memref<32x128xf32, #tpu.memory_space<vmem>>, vector<32x128xf32>
    %1 = arith.truncf %0 : vector<32x128xf32> to vector<32x128xbf16>
    %c128 = arith.constant 128 : index
    %c0_1 = arith.constant 0 : index
    %2 = vector.load %arg2[%c128, %c0_1] : memref<384x128xbf16, #tpu.memory_space<vmem>>, vector<128x128xbf16>
    %cst = arith.constant dense<0.000000e+00> : vector<32x128xf32>
    %3 = tpu.matmul %1, %2, %cst {dimension_numbers = #tpu.dot_dimension_numbers<[1], [0], [0], [1], [0, 0, 1, 1], [], []>} : vector<32x128xbf16>, vector<128x128xbf16>, vector<32x128xf32> -> vector<32x128xf32>
    %c0_2 = arith.constant 0 : index
    %c0_3 = arith.constant 0 : index
    %4 = vector.load %arg9[%c0_2, %c0_3] : memref<32x128xf32, #tpu.memory_space<vmem>>, vector<32x128xf32>
    tpu.vector_store %arg9[%c0_2, %c0_3], %3 {strides = array<i32>} : memref<32x128xf32, #tpu.memory_space<vmem>>, vector<32x128xf32>,
    %c2 = arith.constant 2 : index
    %c0_4 = arith.constant 0 : index
    %5 = vector.load %arg9[%c2, %c0_4] : memref<32x128xf32, #tpu.memory_space<vmem>>, vector<30x128xf32>
    %6 = vector.extract_strided_slice %1 {offsets = [0, 0], sizes = [30, 128], strides = [1, 1]} : vector<32x128xbf16> to vector<30x128xbf16>
    %c0_5 = arith.constant 0 : index
    %c0_6 = arith.constant 0 : index
    %7 = vector.load %arg2[%c0_5, %c0_6] : memref<384x128xbf16, #tpu.memory_space<vmem>>, vector<128x128xbf16>
    %cst_7 = arith.constant dense<0.000000e+00> : vector<30x128xf32>
    %8 = tpu.matmul %6, %7, %cst_7 {dimension_numbers = #tpu.dot_dimension_numbers<[1], [0], [0], [1], [0, 0, 1, 1], [], []>} : vector<30x128xbf16>, vector<128x128xbf16>, vector<30x128xf32> -> vector<30x128xf32>
    %9 = arith.addf %5, %8 : vector<30x128xf32>
    %c2_8 = arith.constant 2 : index
    %c0_9 = arith.constant 0 : index
    %10 = vector.load %arg9[%c2_8, %c0_9] : memref<32x128xf32, #tpu.memory_space<vmem>>, vector<30x128xf32>
    tpu.vector_store %arg9[%c2_8, %c0_9], %9 {strides = array<i32>} : memref<32x128xf32, #tpu.memory_space<vmem>>, vector<30x128xf32>,
    %c0_10 = arith.constant 0 : index
    %c0_11 = arith.constant 0 : index
    %11 = vector.load %arg9[%c0_10, %c0_11] : memref<32x128xf32, #tpu.memory_space<vmem>>, vector<30x128xf32>
    %12 = vector.extract_strided_slice %1 {offsets = [2, 0], sizes = [30, 128], strides = [1, 1]} : vector<32x128xbf16> to vector<30x128xbf16>
    %c256 = arith.constant 256 : index
    %c0_12 = arith.constant 0 : index
    %13 = vector.load %arg2[%c256, %c0_12] : memref<384x128xbf16, #tpu.memory_space<vmem>>, vector<128x128xbf16>
    %cst_13 = arith.constant dense<0.000000e+00> : vector<30x128xf32>
    %14 = tpu.matmul %12, %13, %cst_13 {dimension_numbers = #tpu.dot_dimension_numbers<[1], [0], [0], [1], [0, 0, 1, 1], [], []>} : vector<30x128xbf16>, vector<128x128xbf16>, vector<30x128xf32> -> vector<30x128xf32>
    %15 = arith.addf %11, %14 : vector<30x128xf32>
    %c0_14 = arith.constant 0 : index
    %c0_15 = arith.constant 0 : index
    %16 = vector.load %arg9[%c0_14, %c0_15] : memref<32x128xf32, #tpu.memory_space<vmem>>, vector<30x128xf32>
    tpu.vector_store %arg9[%c0_14, %c0_15], %15 {strides = array<i32>} : memref<32x128xf32, #tpu.memory_space<vmem>>, vector<30x128xf32>,
    %c0_16 = arith.constant 0 : index
    %c0_17 = arith.constant 0 : index
    %17 = vector.load %arg9[%c0_16, %c0_17] : memref<32x128xf32, #tpu.memory_space<vmem>>, vector<32x128xf32>
    %c0_18 = arith.constant 0 : index
    %c0_19 = arith.constant 0 : index
    %18 = vector.load %arg3[%c0_18, %c0_19] : memref<1x128xf32, #tpu.memory_space<vmem>>, vector<1x128xf32>
    %c0_20 = arith.constant 0 : index
    %c0_21 = arith.constant 0 : index
    %19 = vector.load %arg4[%c0_20, %c0_21] : memref<1x128xf32, #tpu.memory_space<vmem>>, vector<1x128xf32>
    %cst_22 = arith.constant dense<0.000000e+00> : vector<128xf32>
    %20 = vector.multi_reduction <add>, %17, %cst_22 [0] : vector<32x128xf32> to vector<128xf32>
    %21 = vector.shape_cast %20 : vector<128xf32> to vector<1x128xf32>
    %22 = arith.mulf %17, %17 : vector<32x128xf32>
    %cst_23 = arith.constant dense<0.000000e+00> : vector<128xf32>
    %23 = vector.multi_reduction <add>, %22, %cst_23 [0] : vector<32x128xf32> to vector<128xf32>
    %24 = vector.shape_cast %23 : vector<128xf32> to vector<1x128xf32>
    %25 = tpu.concatenate %21, %24 in 0 : vector<1x128xf32>, vector<1x128xf32> -> vector<2x128xf32>
    %c0_24 = arith.constant 0 : index
    %c0_25 = arith.constant 0 : index
    %26 = vector.load %arg1[%c0_24, %c0_25] : memref<128x128xf32, #tpu.memory_space<vmem>>, vector<128x128xf32>
    %cst_26 = arith.constant dense<0.000000e+00> : vector<2x128xf32>
    %27 = tpu.matmul %25, %26, %cst_26 {dimension_numbers = #tpu.dot_dimension_numbers<[1], [0], [0], [1], [0, 0, 1, 1], [], []>} : vector<2x128xf32>, vector<128x128xf32>, vector<2x128xf32> -> vector<2x128xf32>
    %cst_27 = arith.constant 0.001953125 : f32
    %28 = vector.broadcast %cst_27 : f32 to vector<2x128xf32>
    %29 = arith.mulf %27, %28 : vector<2x128xf32>
    %30 = vector.extract_strided_slice %29 {offsets = [0, 0], sizes = [1, 128], strides = [1, 1]} : vector<2x128xf32> to vector<1x128xf32>
    %31 = vector.extract_strided_slice %29 {offsets = [1, 0], sizes = [1, 128], strides = [1, 1]} : vector<2x128xf32> to vector<1x128xf32>
    %32 = arith.mulf %30, %30 : vector<1x128xf32>
    %33 = arith.subf %31, %32 : vector<1x128xf32>
    %cst_28 = arith.constant 9.99999974E-6 : f32
    %34 = vector.broadcast %cst_28 : f32 to vector<1x128xf32>
    %35 = arith.addf %33, %34 : vector<1x128xf32>
    %36 = math.rsqrt %35 : vector<1x128xf32>
    %37 = arith.mulf %18, %36 : vector<1x128xf32>
    %38 = arith.mulf %30, %37 : vector<1x128xf32>
    %39 = arith.subf %19, %38 : vector<1x128xf32>
    %40 = vector.broadcast %37 : vector<1x128xf32> to vector<32x128xf32>
    %41 = arith.mulf %17, %40 : vector<32x128xf32>
    %42 = vector.broadcast %39 : vector<1x128xf32> to vector<32x128xf32>
    %43 = arith.addf %41, %42 : vector<32x128xf32>
    %cst_29 = arith.constant 0.000000e+00 : f32
    %44 = vector.broadcast %cst_29 : f32 to vector<32x128xf32>
    %45 = arith.maximumf %43, %44 : vector<32x128xf32>
    %46 = arith.truncf %45 : vector<32x128xf32> to vector<32x128xbf16>
    %c0_30 = arith.constant 0 : index
    %c0_31 = arith.constant 0 : index
    %47 = vector.load %arg10[%c0_30, %c0_31] : memref<32x128xbf16, #tpu.memory_space<vmem>>, vector<32x128xbf16>
    tpu.vector_store %arg10[%c0_30, %c0_31], %46 {strides = array<i32>} : memref<32x128xbf16, #tpu.memory_space<vmem>>, vector<32x128xbf16>,
    %c0_32 = arith.constant 0 : index
    %c0_33 = arith.constant 0 : index
    %48 = vector.load %arg10[%c0_32, %c0_33] : memref<32x128xbf16, #tpu.memory_space<vmem>>, vector<32x128xbf16>
    %c128_34 = arith.constant 128 : index
    %c0_35 = arith.constant 0 : index
    %49 = vector.load %arg5[%c128_34, %c0_35] : memref<384x128xbf16, #tpu.memory_space<vmem>>, vector<128x128xbf16>
    %cst_36 = arith.constant dense<0.000000e+00> : vector<32x128xf32>
    %50 = tpu.matmul %48, %49, %cst_36 {dimension_numbers = #tpu.dot_dimension_numbers<[1], [0], [0], [1], [0, 0, 1, 1], [], []>} : vector<32x128xbf16>, vector<128x128xbf16>, vector<32x128xf32> -> vector<32x128xf32>
    %c0_37 = arith.constant 0 : index
    %c0_38 = arith.constant 0 : index
    %51 = vector.load %arg9[%c0_37, %c0_38] : memref<32x128xf32, #tpu.memory_space<vmem>>, vector<32x128xf32>
    tpu.vector_store %arg9[%c0_37, %c0_38], %50 {strides = array<i32>} : memref<32x128xf32, #tpu.memory_space<vmem>>, vector<32x128xf32>,
    %c2_39 = arith.constant 2 : index
    %c0_40 = arith.constant 0 : index
    %52 = vector.load %arg9[%c2_39, %c0_40] : memref<32x128xf32, #tpu.memory_space<vmem>>, vector<30x128xf32>
    %53 = vector.extract_strided_slice %48 {offsets = [0, 0], sizes = [30, 128], strides = [1, 1]} : vector<32x128xbf16> to vector<30x128xbf16>
    %c0_41 = arith.constant 0 : index
    %c0_42 = arith.constant 0 : index
    %54 = vector.load %arg5[%c0_41, %c0_42] : memref<384x128xbf16, #tpu.memory_space<vmem>>, vector<128x128xbf16>
    %cst_43 = arith.constant dense<0.000000e+00> : vector<30x128xf32>
    %55 = tpu.matmul %53, %54, %cst_43 {dimension_numbers = #tpu.dot_dimension_numbers<[1], [0], [0], [1], [0, 0, 1, 1], [], []>} : vector<30x128xbf16>, vector<128x128xbf16>, vector<30x128xf32> -> vector<30x128xf32>
    %56 = arith.addf %52, %55 : vector<30x128xf32>
    %c2_44 = arith.constant 2 : index
    %c0_45 = arith.constant 0 : index
    %57 = vector.load %arg9[%c2_44, %c0_45] : memref<32x128xf32, #tpu.memory_space<vmem>>, vector<30x128xf32>
    tpu.vector_store %arg9[%c2_44, %c0_45], %56 {strides = array<i32>} : memref<32x128xf32, #tpu.memory_space<vmem>>, vector<30x128xf32>,
    %c0_46 = arith.constant 0 : index
    %c0_47 = arith.constant 0 : index
    %58 = vector.load %arg9[%c0_46, %c0_47] : memref<32x128xf32, #tpu.memory_space<vmem>>, vector<30x128xf32>
    %59 = vector.extract_strided_slice %48 {offsets = [2, 0], sizes = [30, 128], strides = [1, 1]} : vector<32x128xbf16> to vector<30x128xbf16>
    %c256_48 = arith.constant 256 : index
    %c0_49 = arith.constant 0 : index
    %60 = vector.load %arg5[%c256_48, %c0_49] : memref<384x128xbf16, #tpu.memory_space<vmem>>, vector<128x128xbf16>
    %cst_50 = arith.constant dense<0.000000e+00> : vector<30x128xf32>
    %61 = tpu.matmul %59, %60, %cst_50 {dimension_numbers = #tpu.dot_dimension_numbers<[1], [0], [0], [1], [0, 0, 1, 1], [], []>} : vector<30x128xbf16>, vector<128x128xbf16>, vector<30x128xf32> -> vector<30x128xf32>
    %62 = arith.addf %58, %61 : vector<30x128xf32>
    %c0_51 = arith.constant 0 : index
    %c0_52 = arith.constant 0 : index
    %63 = vector.load %arg9[%c0_51, %c0_52] : memref<32x128xf32, #tpu.memory_space<vmem>>, vector<30x128xf32>
    tpu.vector_store %arg9[%c0_51, %c0_52], %62 {strides = array<i32>} : memref<32x128xf32, #tpu.memory_space<vmem>>, vector<30x128xf32>,
    %c0_53 = arith.constant 0 : index
    %c0_54 = arith.constant 0 : index
    %64 = vector.load %arg9[%c0_53, %c0_54] : memref<32x128xf32, #tpu.memory_space<vmem>>, vector<32x128xf32>
    %c0_55 = arith.constant 0 : index
    %c0_56 = arith.constant 0 : index
    %65 = vector.load %arg6[%c0_55, %c0_56] : memref<1x128xf32, #tpu.memory_space<vmem>>, vector<1x128xf32>
    %c0_57 = arith.constant 0 : index
    %c0_58 = arith.constant 0 : index
    %66 = vector.load %arg7[%c0_57, %c0_58] : memref<1x128xf32, #tpu.memory_space<vmem>>, vector<1x128xf32>
    %cst_59 = arith.constant dense<0.000000e+00> : vector<128xf32>
    %67 = vector.multi_reduction <add>, %64, %cst_59 [0] : vector<32x128xf32> to vector<128xf32>
    %68 = vector.shape_cast %67 : vector<128xf32> to vector<1x128xf32>
    %69 = arith.mulf %64, %64 : vector<32x128xf32>
    %cst_60 = arith.constant dense<0.000000e+00> : vector<128xf32>
    %70 = vector.multi_reduction <add>, %69, %cst_60 [0] : vector<32x128xf32> to vector<128xf32>
    %71 = vector.shape_cast %70 : vector<128xf32> to vector<1x128xf32>
    %72 = tpu.concatenate %68, %71 in 0 : vector<1x128xf32>, vector<1x128xf32> -> vector<2x128xf32>
    %c0_61 = arith.constant 0 : index
    %c0_62 = arith.constant 0 : index
    %73 = vector.load %arg1[%c0_61, %c0_62] : memref<128x128xf32, #tpu.memory_space<vmem>>, vector<128x128xf32>
    %cst_63 = arith.constant dense<0.000000e+00> : vector<2x128xf32>
    %74 = tpu.matmul %72, %73, %cst_63 {dimension_numbers = #tpu.dot_dimension_numbers<[1], [0], [0], [1], [0, 0, 1, 1], [], []>} : vector<2x128xf32>, vector<128x128xf32>, vector<2x128xf32> -> vector<2x128xf32>
    %cst_64 = arith.constant 0.001953125 : f32
    %75 = vector.broadcast %cst_64 : f32 to vector<2x128xf32>
    %76 = arith.mulf %74, %75 : vector<2x128xf32>
    %77 = vector.extract_strided_slice %76 {offsets = [0, 0], sizes = [1, 128], strides = [1, 1]} : vector<2x128xf32> to vector<1x128xf32>
    %78 = vector.extract_strided_slice %76 {offsets = [1, 0], sizes = [1, 128], strides = [1, 1]} : vector<2x128xf32> to vector<1x128xf32>
    %79 = arith.mulf %77, %77 : vector<1x128xf32>
    %80 = arith.subf %78, %79 : vector<1x128xf32>
    %cst_65 = arith.constant 9.99999974E-6 : f32
    %81 = vector.broadcast %cst_65 : f32 to vector<1x128xf32>
    %82 = arith.addf %80, %81 : vector<1x128xf32>
    %83 = math.rsqrt %82 : vector<1x128xf32>
    %84 = arith.mulf %65, %83 : vector<1x128xf32>
    %85 = arith.mulf %77, %84 : vector<1x128xf32>
    %86 = arith.subf %66, %85 : vector<1x128xf32>
    %87 = vector.broadcast %84 : vector<1x128xf32> to vector<32x128xf32>
    %88 = arith.mulf %64, %87 : vector<32x128xf32>
    %89 = vector.broadcast %86 : vector<1x128xf32> to vector<32x128xf32>
    %90 = arith.addf %88, %89 : vector<32x128xf32>
    %91 = arith.addf %90, %0 : vector<32x128xf32>
    %cst_66 = arith.constant 0.000000e+00 : f32
    %92 = vector.broadcast %cst_66 : f32 to vector<32x128xf32>
    %93 = arith.maximumf %91, %92 : vector<32x128xf32>
    %c0_67 = arith.constant 0 : index
    %c0_68 = arith.constant 0 : index
    %94 = vector.load %arg8[%c0_67, %c0_68] : memref<32x128xf32, #tpu.memory_space<vmem>>, vector<32x128xf32>
    tpu.vector_store %arg8[%c0_67, %c0_68], %93 {strides = array<i32>} : memref<32x128xf32, #tpu.memory_space<vmem>>, vector<32x128xf32>,
    return
  }
}

</mosaic_0001>

<bundles_post_ra>
// kernel: tpu_custom_call.1
= control target key start
LH: loop header
LB: loop body
LE: loop exit
PB: predicated region body
PF: predicated region fallthrough
CT: control target
= control target key end

     0   :  { %13 = vsyncpa [#allocation5], 0  ;;  %s2013_s0 = inlined_call_operand.hbm [shape: f32[32,128], index: 0, kind: input, shape index: {}]   ;;  %s2014_s1 = inlined_call_operand.hbm [shape: f32[128,128], index: 1, kind: input, shape index: {}]   ;;  %s2015_s2 = inlined_call_operand.hbm [shape: bf16[384,128], index: 2, kind: input, shape index: {}]   ;;  %s2016_s3 = inlined_call_operand.vmem [shape: f32[1,128], index: 3, kind: input, shape index: {}]   ;;  %s2017_s4 = inlined_call_operand.vmem [shape: f32[1,128], index: 4, kind: input, shape index: {}]   ;;  %s2018_s5 = inlined_call_operand.hbm [shape: bf16[384,128], index: 5, kind: input, shape index: {}]   ;;  %s2019_s6 = inlined_call_operand.vmem [shape: f32[1,128], index: 6, kind: input, shape index: {}]   ;;  %s2020_s7 = inlined_call_operand.vmem [shape: f32[1,128], index: 7, kind: input, shape index: {}]   ;;  %s2021_s8 = inlined_call_operand.hbm [shape: f32[32,128], index: 8, kind: output, shape index: {}]  }
   0x1   :  { %14 = vsyncpa [#allocation8], 0 }
   0x2   :  { %15 = vsyncpa [#allocation11], 0 }
   0x3   :  { %16 = vsyncpa [#allocation6], 0  ;;  %s1764_s27 = smov [#allocation7]   ;;  %s1765_s29 = smov [#allocation4]  }
   0x4   :  { %s34_s28 = sshll.u32 %s1764_s27, 4  ;;  %s22_s30 = sshll.u32 %s1765_s29, 4  ;;  %s35_s28 = int_to_ptr.vmem [resolvable:$true] %s34_s28  ;;  %s23_s30 = int_to_ptr.vmem [resolvable:$true] %s22_s30 }
   0x5   :  { %s1664_s9 = scalar_lea.vmem %s35_s28, 2048  ;;  %p1669_p1 = scmp.lt.s32.totalorder %s35_s28, %s35_s28 }
   0x6   :  { %p1665_p0 = scmp.ne.s32.totalorder %s35_s28, %s1664_s9  ;;  %p1670_p2 = scmp.lt.s32.totalorder %s1664_s9, %s1664_s9 }
   0x8   :  { %p1671_p3 = por %p1670_p2, %p1669_p1 }
   0xa   :  { %p1672_p4 = pnand %p1671_p3, %p1665_p0 }
   0xc   :  { %1675 = shalt.err (!%p1672_p4)
}
   0xd   :  { %s1766_s10 = smov 128   ;;  %s1767_s11 = smov 8  }
   0xe   :  { %40 = dma.hbm_to_vmem [thread:$0]  %s2014_s1, 2048, %s35_s28, [#allocation8], %s1766_s10, %s1766_s10, %s1767_s11  }
   0xf   :  { %s1684_s14 = scalar_lea.vmem %s23_s30, 512  ;;  %p1689_p6 = scmp.lt.s32.totalorder %s23_s30, %s23_s30 }
  0x10   :  { %p1685_p5 = scmp.ne.s32.totalorder %s23_s30, %s1684_s14  ;;  %p1690_p7 = scmp.lt.s32.totalorder %s1684_s14, %s1684_s14 }
  0x12   :  { %p1691_p8 = por %p1690_p7, %p1689_p6 }
  0x14   :  { %p1692_p9 = pnand %p1691_p8, %p1685_p5 }
  0x16   :  { %1695 = shalt.err (!%p1692_p9)
}
  0x17   :  { %28 = dma.hbm_to_vmem [thread:$0]  %s2013_s0, 512, %s23_s30, [#allocation5], %s1766_s10, %s1766_s10, %s1767_s11  }
  0x18   :  { %s1768_s17 = smov [#allocation9]  }
  0x19   :  { %s46_s18 = sshll.u32 %s1768_s17, 4  ;;  %s47_s18 = int_to_ptr.vmem [resolvable:$true] %s46_s18 }
  0x1a   :  { %s1704_s19 = scalar_lea.vmem %s47_s18, 3072  ;;  %p1709_p11 = scmp.lt.s32.totalorder %s47_s18, %s47_s18 }
  0x1b   :  { %p1705_p10 = scmp.ne.s32.totalorder %s47_s18, %s1704_s19  ;;  %p1710_p12 = scmp.lt.s32.totalorder %s1704_s19, %s1704_s19 }
  0x1d   :  { %p1711_p13 = por %p1710_p12, %p1709_p11 }
  0x1f   :  { %p1712_p0 = pnand %p1711_p13, %p1705_p10 }
  0x21   :  { %1715 = shalt.err (!%p1712_p0)
}
  0x22   :  { %s1769_s1 = smov 64   ;;  %s1770_s20 = smov 4  }
  0x23   :  { %52 = dma.hbm_to_vmem [thread:$0]  %s2015_s2, 3072, %s47_s18, [#allocation8], %s1769_s1, %s1769_s1, %s1770_s20  }
  0x24   :  { %s1771_s23 = smov [#allocation10]  }
  0x25   :  { %s62_s24 = sshll.u32 %s1771_s23, 4  ;;  %s63_s24 = int_to_ptr.vmem [resolvable:$true] %s62_s24 }
  0x26   :  { %s1724_s0 = scalar_lea.vmem %s63_s24, 3072  ;;  %p1729_p2 = scmp.lt.s32.totalorder %s63_s24, %s63_s24 }
  0x27   :  { %p1725_p1 = scmp.ne.s32.totalorder %s63_s24, %s1724_s0  ;;  %p1730_p3 = scmp.lt.s32.totalorder %s1724_s0, %s1724_s0 }
  0x29   :  { %p1731_p4 = por %p1730_p3, %p1729_p2 }
  0x2b   :  { %p1732_p5 = pnand %p1731_p4, %p1725_p1 }
  0x2d   :  { %1735 = shalt.err (!%p1732_p5)
}
  0x2e   :  { %68 = dma.hbm_to_vmem [thread:$0]  %s2018_s5, 3072, %s63_s24, [#allocation11], %s1769_s1, %s1769_s1, %s1770_s20  }
  0x2f   :  { %1756 = dma.done.wait [#allocation5], 512  }
  0x30   :  { %1757 = vsyncadd [#allocation5], 4294966784 }
  0x31   :  { %1758 = dma.done.wait [#allocation8], 5120  }
  0x32   :  { %1759 = vsyncadd [#allocation8], 4294962176 }
  0x33   :  { %1760 = dma.done.wait [#allocation11], 3072  }
  0x34   :  { %1761 = vsyncadd [#allocation11], 4294964224  ;;  %v1602_v0 = vld [vmem:[#allocation9 + $0x78] sm:$0xff]   ;;  %v1603_v1 = vld [vmem:[#allocation9 + $0x70] sm:$0xff]   ;;  %vm356_vm0 = vcmask 1046528   ;;  %v1772_v33 = vmov 0.0  }
  0x35   :  { %1400 = vmatprep.subr.bf16.mxu0 %v1602_v0  ;;  %v1605_v2 = vld [vmem:[#allocation9 + $0x38] sm:$0xff]   ;;  %v1604_v3 = vld [vmem:[#allocation9 + $0x68] sm:$0xff]   ;;  %v1607_v4 = vld [vmem:[#allocation9 + $0x30] sm:$0xff]   ;;  %vm1773_vm1 = vmmov 0   ;;  %vm495_vm2 = vcmask 1040384  }
  0x36   :  { %1401 = vmatpush3.bf16.msra.mxu0 %v1602_v0  ;;  %1420 = vmatprep.subr.bf16.mxu1 %v1605_v2  ;;  %v1609_v5 = vld [vmem:[#allocation9 + $0x28] sm:$0xff]   ;;  %v1606_v6 = vld [vmem:[#allocation9 + $0x60] sm:$0xff]   ;;  %v1608_v8 = vld [vmem:[#allocation9 + $0x58] sm:$0xff]  }
  0x37   :  { %1402 = vmatprep.subr.bf16.mxu0 %v1603_v1  ;;  %1421 = vmatpush3.bf16.msra.mxu1 %v1605_v2  ;;  %v1611_v7 = vld [vmem:[#allocation9 + $0x20] sm:$0xff]   ;;  %v1841_v10 = vld [vmem:[#allocation4 + $0x8] sm:$0xff]  ;;  %v1613_v11 = vld [vmem:[#allocation9 + $0x18] sm:$0xff]  }
  0x38   :  { %1422 = vmatprep.subr.bf16.mxu1 %v1607_v4  ;;  %v1839_v9 = vld [vmem:[#allocation4] sm:$0xff]  ;;  %v1610_v13 = vld [vmem:[#allocation9 + $0x50] sm:$0xff]   ;;  %v1612_v14 = vld [vmem:[#allocation9 + $0x48] sm:$0xff]  }
  0x39   :  { %v90_v12 = vpack.c.bf16 %v1841_v10, %v1839_v9  ;;  %v1615_v15 = vld [vmem:[#allocation9 + $0x10] sm:$0xff]   ;;  %v1847_v17 = vld [vmem:[#allocation4 + $0x18] sm:$0xff]  ;;  %v1616_v19 = vld [vmem:[#allocation9 + $0x8] sm:$0xff]  }
  0x3a   :  { %1403 = vmatpush3.bf16.msra.mxu0 %v1603_v1  ;;  %v1845_v16 = vld [vmem:[#allocation4 + $0x10] sm:$0xff]  ;;  %v1614_v20 = vld [vmem:[#allocation9 + $0x40] sm:$0xff]   ;;  %v1617_v24 = vld [vmem:[#allocation9 + $0xb8] sm:$0xff]  }
  0x3b   :  { %1404 = vmatprep.subr.bf16.mxu0 %v1604_v3  ;;  %1423 = vmatpush3.bf16.msra.mxu1 %v1607_v4  ;;  %v91_v18 = vpack.c.bf16 %v1847_v17, %v1845_v16  ;;  %v357_v21 = vrot.slane %v90_v12, 1  ;;  %v1618_v22 = vld [vmem:[#allocation9] sm:$0xff]   ;;  %v1619_v25 = vld [vmem:[#allocation9 + $0xb0] sm:$0xff]   ;;  %v1620_v27 = vld [vmem:[#allocation9 + $0xa8] sm:$0xff]  }
  0x3c   :  { %1424 = vmatprep.subr.bf16.mxu1 %v1609_v5  ;;  %1416 = vmatprep.mubr.bf16.mxu0 %v90_v12  ;;  %v1621_v28 = vld [vmem:[#allocation9 + $0xa0] sm:$0xff]   ;;  %v1622_v29 = vld [vmem:[#allocation9 + $0x98] sm:$0xff]   ;;  %v1623_v30 = vld [vmem:[#allocation9 + $0x90] sm:$0xff]  }
  0x3d   :  { %1436 = vmatprep.mubr.bf16.mxu1 %v90_v12  ;;  %v358_v23 = vrot.slane %v91_v18, 1  ;;  %v1624_v31 = vld [vmem:[#allocation9 + $0x88] sm:$0xff]   ;;  %v1625_v32 = vld [vmem:[#allocation9 + $0x80] sm:$0xff]   ;;  %v1853_v34 = vld [vmem:[#allocation7 + $0x78] sm:$0xff] }
  0x3e   :  { %1405 = vmatpush3.bf16.msra.mxu0 %v1604_v3  ;;  %v1857_v35 = vld [vmem:[#allocation7 + $0x70] sm:$0xff]  ;;  %v1861_v36 = vld [vmem:[#allocation7 + $0x68] sm:$0xff]  ;;  %v1865_v37 = vld [vmem:[#allocation7 + $0x60] sm:$0xff] }
  0x3f   :  { %1406 = vmatprep.subr.bf16.mxu0 %v1606_v6  ;;  %1425 = vmatpush3.bf16.msra.mxu1 %v1609_v5  ;;  %v359_v26 = vsel %vm356_vm0, %v357_v21, %v358_v23  ;;  %v1868_v38 = vld [vmem:[#allocation7 + $0x58] sm:$0xff]  ;;  %v1871_v39 = vld [vmem:[#allocation7 + $0x50] sm:$0xff]  ;;  %v1877_v40 = vld [vmem:[#allocation7 + $0x48] sm:$0xff] }
  0x40   :  { %1426 = vmatprep.subr.bf16.mxu1 %v1611_v7  ;;  %v1881_v41 = vld [vmem:[#allocation7 + $0x40] sm:$0xff]  ;;  %v1885_v42 = vld [vmem:[#allocation7 + $0x38] sm:$0xff]  ;;  %v1889_v43 = vld [vmem:[#allocation7 + $0x30] sm:$0xff] }
  0x41   :  { %v1893_v44 = vld [vmem:[#allocation7 + $0x28] sm:$0xff]  ;;  %v1897_v45 = vld [vmem:[#allocation7 + $0x20] sm:$0xff]  ;;  %v1901_v46 = vld [vmem:[#allocation7 + $0x18] sm:$0xff] }
  0x42   :  { %1407 = vmatpush3.bf16.msra.mxu0 %v1606_v6  ;;  %v1905_v47 = vld [vmem:[#allocation7 + $0x10] sm:$0xff]  ;;  %v1909_v48 = vld [vmem:[#allocation7 + $0x8] sm:$0xff]  ;;  %v1913_v49 = vld [vmem:[#allocation7] sm:$0xff] }
  0x43   :  { %1408 = vmatprep.subr.bf16.mxu0 %v1608_v8  ;;  %1427 = vmatpush3.bf16.msra.mxu1 %v1611_v7 }
  0x44   :  { %1428 = vmatprep.subr.bf16.mxu1 %v1613_v11 }
  0x46   :  { %1409 = vmatpush3.bf16.msra.mxu0 %v1608_v8 }
  0x47   :  { %1410 = vmatprep.subr.bf16.mxu0 %v1610_v13  ;;  %1429 = vmatpush3.bf16.msra.mxu1 %v1613_v11 }
  0x48   :  { %1430 = vmatprep.subr.bf16.mxu1 %v1615_v15 }
  0x4a   :  { %1411 = vmatpush3.bf16.msra.mxu0 %v1610_v13 }
  0x4b   :  { %1412 = vmatprep.subr.bf16.mxu0 %v1612_v14  ;;  %1431 = vmatpush3.bf16.msra.mxu1 %v1615_v15 }
  0x4c   :  { %1432 = vmatprep.subr.bf16.mxu1 %v1616_v19 }
  0x4e   :  { %1413 = vmatpush3.bf16.msra.mxu0 %v1612_v14 }
  0x4f   :  { %1414 = vmatprep.subr.bf16.mxu0 %v1614_v20  ;;  %1433 = vmatpush3.bf16.msra.mxu1 %v1616_v19 }
  0x50   :  { %1434 = vmatprep.subr.bf16.mxu1 %v1618_v22 }
  0x52   :  { %1415 = vmatpush3.bf16.msra.mxu0 %v1614_v20 }
  0x53   :  { %1440 = vmatprep.subr.bf16.mxu0 %v1617_v24  ;;  %1435 = vmatpush3.bf16.msra.mxu1 %v1618_v22 }
  0x54   :  { %1460 = vmatprep.subr.mxu1 %v1772_v33 }
  0x55   :  { %1417 = vmatmul.mubr.bf16.vlgmr.msra.gmra.mxu0 %v91_v18 }
  0x56   :  { %1441 = vmatpush3.bf16.msra.mxu0 %v1617_v24  ;;  %1456 = vmatprep.mubr.bf16.mxu0 %v359_v26 }
  0x57   :  { %1442 = vmatprep.subr.bf16.mxu0 %v1619_v25  ;;  %1437 = vmatmul.mubr.bf16.vlgmr.msra.gmra.mxu1 %v91_v18 }
  0x58   :  { %1461 = vmatpush3.msra.mxu1 %v1853_v34  ;;  %1492 = vmatprep.mubr.msk.f32.mxu1 %vm1773_vm1, %v1772_v33 }
  0x59   :  { %1462 = vmatprep.subr.mxu1 %v1772_v33 }
  0x5a   :  { %1443 = vmatpush3.bf16.msra.mxu0 %v1619_v25  ;;  %1463 = vmatpush3.msra.mxu1 %v1857_v35 }
  0x5b   :  { %1444 = vmatprep.subr.bf16.mxu0 %v1620_v27  ;;  %1464 = vmatprep.subr.mxu1 %v1772_v33 }
  0x5c   :  { %1465 = vmatpush3.msra.mxu1 %v1861_v36 }
  0x5d   :  { %1466 = vmatprep.subr.mxu1 %v1772_v33 }
  0x5e   :  { %1445 = vmatpush3.bf16.msra.mxu0 %v1620_v27  ;;  %1467 = vmatpush3.msra.mxu1 %v1865_v37 }
  0x5f   :  { %1446 = vmatprep.subr.bf16.mxu0 %v1621_v28  ;;  %1468 = vmatprep.subr.mxu1 %v1772_v33 }
  0x60   :  { %1469 = vmatpush3.msra.mxu1 %v1868_v38 }
  0x61   :  { %1470 = vmatprep.subr.mxu1 %v1772_v33 }
  0x62   :  { %1447 = vmatpush3.bf16.msra.mxu0 %v1621_v28  ;;  %1471 = vmatpush3.msra.mxu1 %v1871_v39 }
  0x63   :  { %1448 = vmatprep.subr.bf16.mxu0 %v1622_v29  ;;  %1472 = vmatprep.subr.mxu1 %v1772_v33 }
  0x64   :  { %1473 = vmatpush3.msra.mxu1 %v1877_v40 }
  0x65   :  { %1474 = vmatprep.subr.mxu1 %v1772_v33 }
  0x66   :  { %1449 = vmatpush3.bf16.msra.mxu0 %v1622_v29  ;;  %1475 = vmatpush3.msra.mxu1 %v1881_v41 }
  0x67   :  { %1450 = vmatprep.subr.bf16.mxu0 %v1623_v30  ;;  %1476 = vmatprep.subr.mxu1 %v1772_v33 }
  0x68   :  { %1477 = vmatpush3.msra.mxu1 %v1885_v42 }
  0x69   :  { %1478 = vmatprep.subr.mxu1 %v1772_v33 }
  0x6a   :  { %1451 = vmatpush3.bf16.msra.mxu0 %v1623_v30  ;;  %1479 = vmatpush3.msra.mxu1 %v1889_v43 }
  0x6b   :  { %1452 = vmatprep.subr.bf16.mxu0 %v1624_v31  ;;  %1480 = vmatprep.subr.mxu1 %v1772_v33 }
  0x6c   :  { %1481 = vmatpush3.msra.mxu1 %v1893_v44 }
  0x6d   :  { %1482 = vmatprep.subr.mxu1 %v1772_v33 }
  0x6e   :  { %1453 = vmatpush3.bf16.msra.mxu0 %v1624_v31  ;;  %1483 = vmatpush3.msra.mxu1 %v1897_v45 }
  0x6f   :  { %1454 = vmatprep.subr.bf16.mxu0 %v1625_v32  ;;  %1484 = vmatprep.subr.mxu1 %v1772_v33 }
  0x70   :  { %1485 = vmatpush3.msra.mxu1 %v1901_v46 }
  0x71   :  { %1486 = vmatprep.subr.mxu1 %v1772_v33 }
  0x72   :  { %1455 = vmatpush3.bf16.msra.mxu0 %v1625_v32  ;;  %1487 = vmatpush3.msra.mxu1 %v1905_v47 }
  0x73   :  { %1488 = vmatprep.subr.mxu1 %v1772_v33 }
  0x74   :  { %1489 = vmatpush3.msra.mxu1 %v1909_v48 }
  0x75   :  { %1457 = vmatmul.mubr.bf16.vlgmr.msra.gmra.mxu0 %v358_v23  ;;  %1490 = vmatprep.subr.mxu1 %v1772_v33 }
  0x76   :  { %1491 = vmatpush3.msra.mxu1 %v1913_v49 }
 0x115   :  { %v1418_v50 = vpop.f32.mrf.mxu0 }
 0x116   :  { %207 = vst [vmem:[#allocation2 + $0x10] sm:$0xff] %v1418_v50 }
 0x117   :  { %v190_v51 = vpop.f32.mrf.mxu0  ;;  %v1438_v52 = vpop.f32.mrf.mxu1 }
 0x118   :  { %205 = vst [vmem:[#allocation2] sm:$0xff] %v190_v51 }
 0x119   :  { %v1419_v53 = vpop.f32.mrf.mxu0  ;;  %v311_v54 = vpop.f32.mrf.mxu1 }
 0x11a   :  { %208 = vst [vmem:[#allocation2 + $0x18] sm:$0xff] %v1419_v53 }
 0x11b   :  { %v193_v55 = vpop.f32.mrf.mxu0  ;;  %v1439_v56 = vpop.f32.mrf.mxu1 }
 0x11c   :  { %206 = vst [vmem:[#allocation2 + $0x8] sm:$0xff] %v193_v55 }
 0x11d   :  { %v314_v59 = vpop.f32.mrf.mxu1 }
 0x121   :  { %v211_v57 = vld [vmem:[#allocation2 + $0x12] sm:$0xff]  ;;  %v212_v58 = vld [vmem:[#allocation2 + $0x1a] sm:$0x3f] }
 0x122   :  { %v328_v60 = vadd.f32 %v1438_v52, %v211_v57  ;;  %v329_v61 = vadd.f32 %v1439_v56, %v212_v58 }
 0x123   :  { %v209_v62 = vld [vmem:[#allocation2 + $0x2] sm:$0xff]  ;;  %v210_v63 = vld [vmem:[#allocation2 + $0xa] sm:$0xff] }
 0x124   :  { %332 = vst [vmem:[#allocation2 + $0x12] sm:$0xff] %v328_v60  ;;  %v326_v0 = vadd.f32 %v311_v54, %v209_v62  ;;  %333 = vst [vmem:[#allocation2 + $0x1a] sm:$0x3f] %v329_v61  ;;  %v327_v1 = vadd.f32 %v314_v59, %v210_v63  ;;  %v1626_v59 = vld [vmem:[#allocation10 + $0x78] sm:$0xff]   ;;  %v1628_v61 = vld [vmem:[#allocation10 + $0x70] sm:$0xff]  }
 0x125   :  { %v1627_v60 = vld [vmem:[#allocation10 + $0x38] sm:$0xff]   ;;  %1495 = vmatprep.subr.bf16.mxu0 %v1626_v59  ;;  %v1629_v62 = vld [vmem:[#allocation10 + $0x30] sm:$0xff]   ;;  %v1630_v63 = vld [vmem:[#allocation10 + $0x68] sm:$0xff]  }
 0x126   :  { %330 = vst [vmem:[#allocation2 + $0x2] sm:$0xff] %v326_v0  ;;  %331 = vst [vmem:[#allocation2 + $0xa] sm:$0xff] %v327_v1  ;;  %1496 = vmatpush3.bf16.msra.mxu0 %v1626_v59  ;;  %1515 = vmatprep.subr.bf16.mxu1 %v1627_v60  ;;  %v1631_v0 = vld [vmem:[#allocation10 + $0x28] sm:$0xff]   ;;  %v1632_v1 = vld [vmem:[#allocation10 + $0x60] sm:$0xff]  }
 0x127   :  { %1497 = vmatprep.subr.bf16.mxu0 %v1628_v61 }
 0x12a   :  { %1498 = vmatpush3.bf16.msra.mxu0 %v1628_v61 }
 0x12b   :  { %v337_v5 = vld [vmem:[#allocation2 + $0x18] sm:$0x3f]  ;;  %1499 = vmatprep.subr.bf16.mxu0 %v1630_v63 }
 0x12d   :  { %v334_v4 = vld [vmem:[#allocation2] sm:$0xff]  ;;  %v335_v11 = vld [vmem:[#allocation2 + $0x8] sm:$0xff]  ;;  %v336_v14 = vld [vmem:[#allocation2 + $0x10] sm:$0xff] }
 0x12e   :  { %1500 = vmatpush3.bf16.msra.mxu0 %v1630_v63 }
 0x12f   :  { %1501 = vmatprep.subr.bf16.mxu0 %v1632_v1 }
 0x132   :  { %1502 = vmatpush3.bf16.msra.mxu0 %v1632_v1 }
 0x135   :  { %v1458_v2 = vpop.f32.mrf.mxu0 }
 0x136   :  { %v1922_v15 = vadd.f32 %v1458_v2, %v336_v14  ;;  %v1633_v2 = vld [vmem:[#allocation10 + $0x20] sm:$0xff]  }
 0x137   :  { %v444_v3 = vpop.f32.mrf.mxu0  ;;  %v1641_v14 = vld [vmem:[#allocation10] sm:$0xff]  }
 0x138   :  { %v1918_v7 = vadd.f32 %v444_v3, %v334_v4  ;;  %v484_v23 = vmul.f32 %v1922_v15, %v1922_v15  ;;  %v1634_v3 = vld [vmem:[#allocation10 + $0x58] sm:$0xff]  }
 0x139   :  { %v1459_v6 = vpop.f32.mrf.mxu0  ;;  %v1635_v4 = vld [vmem:[#allocation10 + $0x18] sm:$0xff]   ;;  %1503 = vmatprep.subr.bf16.mxu0 %v1634_v3 }
 0x13a   :  { %v462_v8 = vadd.f32 %v1459_v6, %v337_v5  ;;  %v482_v19 = vmul.f32 %v1918_v7, %v1918_v7  ;;  %1504 = vmatpush3.bf16.msra.mxu0 %v1634_v3  ;;  %v1636_v5 = vld [vmem:[#allocation10 + $0x50] sm:$0xff]  }
 0x13b   :  { %v447_v12 = vpop.f32.mrf.mxu0  ;;  %v1637_v6 = vld [vmem:[#allocation10 + $0x10] sm:$0xff]   ;;  %1505 = vmatprep.subr.bf16.mxu0 %v1636_v5 }
 0x13c   :  { %466 = vst [vmem:[#allocation2 + $0x18] sm:$0x3f] %v462_v8  ;;  %v1920_v13 = vadd.f32 %v447_v12, %v335_v11  ;;  %v1638_v8 = vld [vmem:[#allocation10 + $0x48] sm:$0xff]   ;;  %v1640_v12 = vld [vmem:[#allocation10 + $0x40] sm:$0xff]  }
 0x13d   :  { %v1639_v11 = vld [vmem:[#allocation10 + $0x8] sm:$0xff]  }
 0x13e   :  { %v473_v18 = vadd.f32 %v1920_v13, %v1918_v7  ;;  %v483_v20 = vmul.f32 %v1920_v13, %v1920_v13  ;;  %1506 = vmatpush3.bf16.msra.mxu0 %v1636_v5 }
 0x13f   :  { %1507 = vmatprep.subr.bf16.mxu0 %v1638_v8 }
 0x140   :  { %v486_v21 = vadd.f32 %v483_v20, %v482_v19  ;;  %v474_v22 = vadd.f32 %v473_v18, %v1922_v15  ;;  %v1643_v18 = vld [vmem:[#allocation10 + $0xb8] sm:$0xff]  }
 0x142   :  { %v487_v27 = vadd.f32 %v486_v21, %v484_v23  ;;  %1508 = vmatpush3.bf16.msra.mxu0 %v1638_v8 }
 0x143   :  { %v1933_v24 = vld [vmem:[#allocation2 + $0x18] sm:$0xff]  ;;  %1509 = vmatprep.subr.bf16.mxu0 %v1640_v12 }
 0x144   :  { %v475_v25 = vadd.f32 %v474_v22, %v1933_v24  ;;  %v485_v26 = vmul.f32 %v1933_v24, %v1933_v24 }
 0x146   :  { %v476_v28 = vrot.slane %v475_v25, 4  ;;  %v488_v29 = vadd.f32 %v487_v27, %v485_v26  ;;  %1510 = vmatpush3.bf16.msra.mxu0 %v1640_v12  ;;  %v1774_v27 = vmov 1966171168  }
 0x147   :  { %1535 = vmatprep.subr.bf16.mxu0 %v1643_v18 }
 0x148   :  { %v477_v30 = vadd.f32 %v476_v28, %v475_v25  ;;  %v489_v31 = vrot.slane %v488_v29, 4  ;;  %v593_v28 = vunpack.c.l.s4 %v1774_v27 }
 0x14a   :  { %v478_v32 = vrot.slane %v477_v30, 2  ;;  %v490_v50 = vadd.f32 %v489_v31, %v488_v29  ;;  %v595_v29 = vlaneseq }
 0x14c   :  { %v479_v51 = vadd.f32 %v478_v32, %v477_v30  ;;  %v491_v52 = vrot.slane %v490_v50, 2  ;;  %v594_v30 = vunpack.c.0.s8 %v593_v28  ;;  %v596_v31 = vshrl.u32 %v595_v29, 7 }
 0x14e   :  { %v480_v53 = vrot.slane %v479_v51, 1  ;;  %v492_v54 = vadd.f32 %v491_v52, %v490_v50  ;;  %v1940_v32 = vsub.s32 %v594_v30, %v596_v31 }
 0x150   :  { %v493_v55 = vrot.slane %v492_v54, 1  ;;  %v481_v56 = vadd.f32 %v480_v53, %v479_v51  ;;  %v471_v53 = vld [vmem:[%s2016_s3] sm:$0x1] }
 0x152   :  { %v494_v57 = vadd.f32 %v493_v55, %v492_v54  ;;  %v1947_v55 = vsub.s32 0, %v596_v31 }
 0x154   :  { %v496_v58 = vsel %vm495_vm2, %v481_v56, %v494_v57  ;;  %v472_v57 = vld [vmem:[%s2017_s4] sm:$0x1] }
 0x155   :  { %1493 = vmatmul.mubr.f32.vlgmr.msra.gmra.mxu1 %v496_v58 }
 0x156   :  { %1516 = vmatpush3.bf16.msra.mxu1 %v1627_v60 }
 0x157   :  { %1517 = vmatprep.subr.bf16.mxu1 %v1629_v62 }
 0x15a   :  { %1518 = vmatpush3.bf16.msra.mxu1 %v1629_v62 }
 0x15b   :  { %1519 = vmatprep.subr.bf16.mxu1 %v1631_v0 }
 0x15e   :  { %1520 = vmatpush3.bf16.msra.mxu1 %v1631_v0 }
 0x15f   :  { %1521 = vmatprep.subr.bf16.mxu1 %v1633_v2 }
 0x162   :  { %1522 = vmatpush3.bf16.msra.mxu1 %v1633_v2 }
 0x163   :  { %1523 = vmatprep.subr.bf16.mxu1 %v1635_v4 }
 0x166   :  { %1524 = vmatpush3.bf16.msra.mxu1 %v1635_v4 }
 0x167   :  { %1525 = vmatprep.subr.bf16.mxu1 %v1637_v6 }
 0x16a   :  { %1526 = vmatpush3.bf16.msra.mxu1 %v1637_v6 }
 0x16b   :  { %1527 = vmatprep.subr.bf16.mxu1 %v1639_v11 }
 0x16e   :  { %1528 = vmatpush3.bf16.msra.mxu1 %v1639_v11 }
 0x16f   :  { %1529 = vmatprep.subr.bf16.mxu1 %v1641_v14 }
 0x172   :  { %1530 = vmatpush3.bf16.msra.mxu1 %v1641_v14 }
 0x173   :  { %1555 = vmatprep.subr.mxu1 %v1772_v33 }
 0x215   :  { %v579_v19 = vpop.f32.mrf.mxu1 }
 0x216   :  { %v583_v20 = vmul.f32 0.001953125, %v579_v19 }
 0x217   :  { %v1494_v21 = vpop.f32.mrf.mxu1 }
 0x218   :  { %v584_v22 = vmul.f32 %v583_v20, %v583_v20 }
 0x21a   :  { %v586_v23 = vrot.slane %v584_v22, 7  ;;  %v1646_v22 = vld [vmem:[#allocation10 + $0xa8] sm:$0xff]  }
 0x21c   :  { %v588_v25 = vsub.f32 %v583_v20, %v586_v23 }
 0x21e   :  { %v589_v26 = vadd.f32 1e-05, %v588_v25 }
 0x220   :  { %1652 = vrsqrt.f32 %v589_v26 }
 0x22d   :  { %v1653_v50 = vpop.eup %1652 }
 0x22e   :  { %v598_v51 = vrot.slane %v1653_v50, %v1940_v32 }
 0x230   :  { %v599_v52 = vcombine.high %v598_v51, %v598_v51 }
 0x232   :  { %v606_v54 = vrot.slane %v599_v52, %v1940_v32 }
 0x234   :  { %v608_v56 = vmul.f32 %v606_v54, %v471_v53 }
 0x236   :  { %v609_v58 = vmul.f32 %v608_v56, %v583_v20  ;;  %v615_v59 = vrot.slane %v608_v56, %v1947_v55 }
 0x238   :  { %v610_v60 = vsub.f32 %v472_v57, %v609_v58  ;;  %v617_v61 = vmul.f32 %v615_v59, %v1918_v7  ;;  %v618_v62 = vmul.f32 %v615_v59, %v1920_v13  ;;  %v619_v63 = vmul.f32 %v615_v59, %v1922_v15  ;;  %v1645_v7 = vld [vmem:[#allocation10 + $0xb0] sm:$0xff]  }
 0x239   :  { %v620_v0 = vmul.f32 %v615_v59, %v1933_v24 }
 0x23a   :  { %v625_v1 = vrot.slane %v610_v60, %v1947_v55 }
 0x23c   :  { %v627_v2 = vadd.f32 %v625_v1, %v617_v61  ;;  %v628_v3 = vadd.f32 %v625_v1, %v618_v62  ;;  %v629_v4 = vadd.f32 %v625_v1, %v619_v63  ;;  %v630_v5 = vadd.f32 %v625_v1, %v620_v0 }
 0x23e   :  { %v631_v6 = vmax.f32 %v627_v2, 0.0  ;;  %v632_v8 = vmax.f32 %v628_v3, 0.0  ;;  %v633_v11 = vmax.f32 %v629_v4, 0.0  ;;  %v634_v12 = vmax.f32 %v630_v5, 0.0 }
 0x240   :  { %v1298_v14 = vpack.c.bf16 %v632_v8, %v631_v6  ;;  %v1303_v19 = vpack.c.bf16 %v634_v12, %v633_v11 }
 0x242   :  { %1299 = vst [vmem:[#allocation3] sm:$0xff] %v1298_v14   ;;  %1305 = vst [vmem:[#allocation3 + $0x8] sm:$0xff] %v1303_v19  }
 0x249   :  { %v1642_v13 = vld [vmem:[#allocation3] sm:$0xff]   ;;  %v1644_v20 = vld [vmem:[#allocation3 + $0x8] sm:$0xff]  }
 0x24a   :  { %1511 = vmatprep.mubr.bf16.mxu0 %v1642_v13  ;;  %1531 = vmatprep.mubr.bf16.mxu1 %v1642_v13  ;;  %v933_v15 = vrot.slane %v1642_v13, 1  ;;  %v934_v24 = vrot.slane %v1644_v20, 1 }
 0x24b   :  { %1512 = vmatmul.mubr.bf16.vlgmr.msra.gmra.mxu0 %v1644_v20  ;;  %1532 = vmatmul.mubr.bf16.vlgmr.msra.gmra.mxu1 %v1644_v20 }
 0x24c   :  { %1536 = vmatpush3.bf16.msra.mxu0 %v1643_v18  ;;  %1556 = vmatpush3.msra.mxu1 %v1853_v34  ;;  %v935_v21 = vsel %vm356_vm0, %v933_v15, %v934_v24  ;;  %v1647_v18 = vld [vmem:[#allocation10 + $0xa0] sm:$0xff]   ;;  %v1648_v34 = vld [vmem:[#allocation10 + $0x98] sm:$0xff]  }
 0x24d   :  { %1537 = vmatprep.subr.bf16.mxu0 %v1645_v7  ;;  %1557 = vmatprep.subr.mxu1 %v1772_v33 }
 0x24e   :  { %1551 = vmatprep.mubr.bf16.mxu0 %v935_v21  ;;  %1558 = vmatpush3.msra.mxu1 %v1857_v35  ;;  %v1649_v35 = vld [vmem:[#allocation10 + $0x90] sm:$0xff]  }
 0x24f   :  { %1559 = vmatprep.subr.mxu1 %v1772_v33  ;;  %1587 = vmatprep.mubr.msk.f32.mxu1 %vm1773_vm1, %v1772_v33 }
 0x250   :  { %1538 = vmatpush3.bf16.msra.mxu0 %v1645_v7  ;;  %1560 = vmatpush3.msra.mxu1 %v1861_v36  ;;  %v1650_v36 = vld [vmem:[#allocation10 + $0x88] sm:$0xff]  }
 0x251   :  { %1539 = vmatprep.subr.bf16.mxu0 %v1646_v22  ;;  %1561 = vmatprep.subr.mxu1 %v1772_v33 }
 0x252   :  { %1562 = vmatpush3.msra.mxu1 %v1865_v37  ;;  %v1651_v37 = vld [vmem:[#allocation10 + $0x80] sm:$0xff]  }
 0x253   :  { %1563 = vmatprep.subr.mxu1 %v1772_v33 }
 0x254   :  { %1540 = vmatpush3.bf16.msra.mxu0 %v1646_v22  ;;  %1564 = vmatpush3.msra.mxu1 %v1868_v38 }
 0x255   :  { %1541 = vmatprep.subr.bf16.mxu0 %v1647_v18  ;;  %1565 = vmatprep.subr.mxu1 %v1772_v33 }
 0x256   :  { %1566 = vmatpush3.msra.mxu1 %v1871_v39 }
 0x257   :  { %1567 = vmatprep.subr.mxu1 %v1772_v33 }
 0x258   :  { %1542 = vmatpush3.bf16.msra.mxu0 %v1647_v18  ;;  %1568 = vmatpush3.msra.mxu1 %v1877_v40 }
 0x259   :  { %1543 = vmatprep.subr.bf16.mxu0 %v1648_v34  ;;  %1569 = vmatprep.subr.mxu1 %v1772_v33 }
 0x25a   :  { %1570 = vmatpush3.msra.mxu1 %v1881_v41 }
 0x25b   :  { %1571 = vmatprep.subr.mxu1 %v1772_v33 }
 0x25c   :  { %1544 = vmatpush3.bf16.msra.mxu0 %v1648_v34  ;;  %1572 = vmatpush3.msra.mxu1 %v1885_v42 }
 0x25d   :  { %1545 = vmatprep.subr.bf16.mxu0 %v1649_v35  ;;  %1573 = vmatprep.subr.mxu1 %v1772_v33 }
 0x25e   :  { %1574 = vmatpush3.msra.mxu1 %v1889_v43 }
 0x25f   :  { %1575 = vmatprep.subr.mxu1 %v1772_v33 }
 0x260   :  { %1546 = vmatpush3.bf16.msra.mxu0 %v1649_v35  ;;  %1576 = vmatpush3.msra.mxu1 %v1893_v44 }
 0x261   :  { %1547 = vmatprep.subr.bf16.mxu0 %v1650_v36  ;;  %1577 = vmatprep.subr.mxu1 %v1772_v33 }
 0x262   :  { %1578 = vmatpush3.msra.mxu1 %v1897_v45 }
 0x263   :  { %1579 = vmatprep.subr.mxu1 %v1772_v33 }
 0x264   :  { %1548 = vmatpush3.bf16.msra.mxu0 %v1650_v36  ;;  %1580 = vmatpush3.msra.mxu1 %v1901_v46 }
 0x265   :  { %1549 = vmatprep.subr.bf16.mxu0 %v1651_v37  ;;  %1581 = vmatprep.subr.mxu1 %v1772_v33 }
 0x266   :  { %1582 = vmatpush3.msra.mxu1 %v1905_v47 }
 0x267   :  { %1583 = vmatprep.subr.mxu1 %v1772_v33 }
 0x268   :  { %1550 = vmatpush3.bf16.msra.mxu0 %v1651_v37  ;;  %1584 = vmatpush3.msra.mxu1 %v1909_v48 }
 0x269   :  { %1585 = vmatprep.subr.mxu1 %v1772_v33 }
 0x26a   :  { %1586 = vmatpush3.msra.mxu1 %v1913_v49 }
 0x26b   :  { %1552 = vmatmul.mubr.bf16.vlgmr.msra.gmra.mxu0 %v934_v24 }
 0x30b   :  { %v1513_v38 = vpop.f32.mrf.mxu0  ;;  %v1533_v39 = vpop.f32.mrf.mxu1 }
 0x30c   :  { %786 = vst [vmem:[#allocation2 + $0x10] sm:$0xff] %v1513_v38 }
 0x30d   :  { %v769_v40 = vpop.f32.mrf.mxu0  ;;  %v890_v42 = vpop.f32.mrf.mxu1 }
 0x30e   :  { %784 = vst [vmem:[#allocation2] sm:$0xff] %v769_v40 }
 0x30f   :  { %v1514_v41 = vpop.f32.mrf.mxu0  ;;  %v1534_v44 = vpop.f32.mrf.mxu1 }
 0x310   :  { %787 = vst [vmem:[#allocation2 + $0x18] sm:$0xff] %v1514_v41 }
 0x311   :  { %v772_v43 = vpop.f32.mrf.mxu0  ;;  %v893_v25 = vpop.f32.mrf.mxu1 }
 0x312   :  { %785 = vst [vmem:[#allocation2 + $0x8] sm:$0xff] %v772_v43 }
 0x317   :  { %v791_v45 = vld [vmem:[#allocation2 + $0x1a] sm:$0x3f]  ;;  %v790_v46 = vld [vmem:[#allocation2 + $0x12] sm:$0xff] }
 0x318   :  { %v908_v47 = vadd.f32 %v1534_v44, %v791_v45  ;;  %v907_v48 = vadd.f32 %v1533_v39, %v790_v46  ;;  %v1048_v45 = vld [vmem:[%s2020_s7] sm:$0x1] }
 0x319   :  { %v788_v23 = vld [vmem:[#allocation2 + $0x2] sm:$0xff]  ;;  %v789_v33 = vld [vmem:[#allocation2 + $0xa] sm:$0xff] }
 0x31a   :  { %912 = vst [vmem:[#allocation2 + $0x1a] sm:$0x3f] %v908_v47  ;;  %v905_v49 = vadd.f32 %v890_v42, %v788_v23  ;;  %v906_v26 = vadd.f32 %v893_v25, %v789_v33  ;;  %911 = vst [vmem:[#allocation2 + $0x12] sm:$0xff] %v907_v48  ;;  %v1047_v42 = vld [vmem:[%s2019_s6] sm:$0x1]  ;;  %s1775_s6 = smov [#allocation12]  }
 0x31b   :  { %s1223_s9 = sshll.u32 %s1775_s6, 4  ;;  %s1224_s9 = int_to_ptr.vmem [resolvable:$true] %s1223_s9 }
 0x31c   :  { %909 = vst [vmem:[#allocation2 + $0x2] sm:$0xff] %v905_v49  ;;  %910 = vst [vmem:[#allocation2 + $0xa] sm:$0xff] %v906_v26  ;;  %s1736_s7 = scalar_lea.vmem %s1224_s9, 512  ;;  %p1741_p7 = scmp.lt.s32.totalorder %s1224_s9, %s1224_s9 }
 0x31d   :  { %p1737_p6 = scmp.ne.s32.totalorder %s1224_s9, %s1736_s7  ;;  %p1742_p8 = scmp.lt.s32.totalorder %s1736_s7, %s1736_s7 }
 0x31f   :  { %p1743_p9 = por %p1742_p8, %p1741_p7 }
 0x321   :  { %v916_v51 = vld [vmem:[#allocation2 + $0x18] sm:$0x3f]  ;;  %p1744_p10 = pnand %p1743_p9, %p1737_p6 }
 0x323   :  { %v915_v27 = vld [vmem:[#allocation2 + $0x10] sm:$0xff]  ;;  %v913_v30 = vld [vmem:[#allocation2] sm:$0xff]  ;;  %v914_v54 = vld [vmem:[#allocation2 + $0x8] sm:$0xff] }
 0x32b   :  { %v1553_v28 = vpop.f32.mrf.mxu0 }
 0x32c   :  { %v1037_v29 = vadd.f32 %v1553_v28, %v915_v27 }
 0x32d   :  { %v1020_v31 = vpop.f32.mrf.mxu0 }
 0x32e   :  { %1041 = vst [vmem:[#allocation2 + $0x10] sm:$0xff] %v1037_v29  ;;  %v1035_v50 = vadd.f32 %v1020_v31, %v913_v30  ;;  %v1060_v63 = vmul.f32 %v1037_v29, %v1037_v29 }
 0x32f   :  { %v1554_v52 = vpop.f32.mrf.mxu0 }
 0x330   :  { %1039 = vst [vmem:[#allocation2] sm:$0xff] %v1035_v50  ;;  %v1038_v53 = vadd.f32 %v1554_v52, %v916_v51  ;;  %v1058_v59 = vmul.f32 %v1035_v50, %v1035_v50 }
 0x331   :  { %v1023_v56 = vpop.f32.mrf.mxu0 }
 0x332   :  { %1042 = vst [vmem:[#allocation2 + $0x18] sm:$0x3f] %v1038_v53  ;;  %v1036_v57 = vadd.f32 %v1023_v56, %v914_v54 }
 0x334   :  { %1040 = vst [vmem:[#allocation2 + $0x8] sm:$0xff] %v1036_v57  ;;  %v1049_v58 = vadd.f32 %v1036_v57, %v1035_v50  ;;  %v1059_v60 = vmul.f32 %v1036_v57, %v1036_v57 }
 0x336   :  { %v1062_v61 = vadd.f32 %v1059_v60, %v1058_v59  ;;  %v1050_v62 = vadd.f32 %v1049_v58, %v1037_v29 }
 0x338   :  { %v1063_v3 = vadd.f32 %v1062_v61, %v1060_v63 }
 0x339   :  { %v1046_v0 = vld [vmem:[#allocation2 + $0x18] sm:$0xff] }
 0x33a   :  { %v1051_v1 = vadd.f32 %v1050_v62, %v1046_v0  ;;  %v1061_v2 = vmul.f32 %v1046_v0, %v1046_v0 }
 0x33c   :  { %v1052_v4 = vrot.slane %v1051_v1, 4  ;;  %v1064_v5 = vadd.f32 %v1063_v3, %v1061_v2 }
 0x33e   :  { %v1053_v6 = vadd.f32 %v1052_v4, %v1051_v1  ;;  %v1065_v8 = vrot.slane %v1064_v5, 4 }
 0x340   :  { %v1054_v11 = vrot.slane %v1053_v6, 2  ;;  %v1066_v12 = vadd.f32 %v1065_v8, %v1064_v5 }
 0x342   :  { %v1055_v14 = vadd.f32 %v1054_v11, %v1053_v6  ;;  %v1067_v19 = vrot.slane %v1066_v12, 2 }
 0x344   :  { %v1056_v7 = vrot.slane %v1055_v14, 1  ;;  %v1068_v13 = vadd.f32 %v1067_v19, %v1066_v12 }
 0x346   :  { %v1069_v20 = vrot.slane %v1068_v13, 1  ;;  %v1057_v15 = vadd.f32 %v1056_v7, %v1055_v14 }
 0x348   :  { %v1070_v24 = vadd.f32 %v1069_v20, %v1068_v13 }
 0x34a   :  { %v1071_v21 = vsel %vm495_vm2, %v1057_v15, %v1070_v24 }
 0x34b   :  { %1588 = vmatmul.mubr.f32.vlgmr.msra.gmra.mxu1 %v1071_v21 }
 0x40b   :  { %v1154_v22 = vpop.f32.mrf.mxu1 }
 0x40c   :  { %v1158_v18 = vmul.f32 0.001953125, %v1154_v22 }
 0x40d   :  { %v1589_v34 = vpop.f32.mrf.mxu1 }
 0x40e   :  { %v1159_v35 = vmul.f32 %v1158_v18, %v1158_v18 }
 0x410   :  { %v1161_v36 = vrot.slane %v1159_v35, 7 }
 0x412   :  { %v1163_v37 = vsub.f32 %v1158_v18, %v1161_v36 }
 0x414   :  { %v1164_v38 = vadd.f32 1e-05, %v1163_v37 }
 0x416   :  { %1654 = vrsqrt.f32 %v1164_v38 }
 0x423   :  { %v1655_v39 = vpop.eup %1654 }
 0x424   :  { %v1173_v40 = vrot.slane %v1655_v39, %v1940_v32 }
 0x426   :  { %v1174_v41 = vcombine.high %v1173_v40, %v1173_v40 }
 0x428   :  { %v1181_v43 = vrot.slane %v1174_v41, %v1940_v32 }
 0x42a   :  { %v1183_v44 = vmul.f32 %v1181_v43, %v1047_v42 }
 0x42c   :  { %v1184_v46 = vmul.f32 %v1183_v44, %v1158_v18  ;;  %v1190_v47 = vrot.slane %v1183_v44, %v1947_v55 }
 0x42e   :  { %v1185_v48 = vsub.f32 %v1048_v45, %v1184_v46  ;;  %v1192_v23 = vmul.f32 %v1190_v47, %v1035_v50  ;;  %v1193_v25 = vmul.f32 %v1190_v47, %v1036_v57  ;;  %v1194_v49 = vmul.f32 %v1190_v47, %v1037_v29 }
 0x42f   :  { %v1195_v26 = vmul.f32 %v1190_v47, %v1046_v0 }
 0x430   :  { %v1200_v33 = vrot.slane %v1185_v48, %v1947_v55 }
 0x432   :  { %v1202_v27 = vadd.f32 %v1200_v33, %v1192_v23  ;;  %v1203_v28 = vadd.f32 %v1200_v33, %v1193_v25  ;;  %v1204_v30 = vadd.f32 %v1200_v33, %v1194_v49  ;;  %v1205_v31 = vadd.f32 %v1200_v33, %v1195_v26 }
 0x434   :  { %v1206_v32 = vadd.f32 %v1202_v27, %v1839_v9  ;;  %v1207_v51 = vadd.f32 %v1203_v28, %v1841_v10  ;;  %v1208_v52 = vadd.f32 %v1204_v30, %v1845_v16  ;;  %v1209_v53 = vadd.f32 %v1205_v31, %v1847_v17 }
 0x436   :  { %v1210_v50 = vmax.f32 %v1206_v32, 0.0  ;;  %v1211_v54 = vmax.f32 %v1207_v51, 0.0  ;;  %v1212_v55 = vmax.f32 %v1208_v52, 0.0  ;;  %v1213_v56 = vmax.f32 %v1209_v53, 0.0 }
 0x438   :  { %1214 = vst [vmem:[#allocation12] sm:$0xff] %v1210_v50  ;;  %1215 = vst [vmem:[#allocation12 + $0x8] sm:$0xff] %v1211_v54 }
 0x439   :  { %1216 = vst [vmem:[#allocation12 + $0x10] sm:$0xff] %v1212_v55  ;;  %1217 = vst [vmem:[#allocation12 + $0x18] sm:$0xff] %v1213_v56 }
 0x43a   :  { %1747 = shalt.err (!%p1744_p10)
}
 0x43b   :  { %1229 = dma.vmem_to_hbm [thread:$0]  %s1224_s9, 512, %s2021_s8, [#allocation6], %s1766_s10, %s1766_s10, %s1767_s11  }
 0x43c   :  { %1762 = dma.done.wait [#allocation6], 512  }
 0x43d   :  { %1763 = vsyncadd [#allocation6], 4294966784 }
 0x43e   :  { %1233 = vsyncpa [#allocation5], 1 }
 0x43f   :  { %1234 = vsyncpa [#allocation8], 1 }
 0x440   :  { %1235 = vsyncpa [#allocation11], 1 }
 0x441   :  { %1236 = vsyncpa [#allocation6], 1 }

</bundles_post_ra>
